<compile_context>
chip_gen: v5e
topology: v5e:2x2
jax: 0.10.0
libtpu: 0.0.40
codegen_flags: <defaults>
</compile_context>

<pallas_src>
import functools

import jax
import jax.numpy as jnp
from jax import lax
from jax.experimental import pallas as pl
from jax.experimental.pallas import tpu as pltpu


def _round_up(x, m):
    return ((x + m - 1) // m) * m


def _pick_batch_tile(B):
    """Large, lane-aligned, megacore-aware batch tiles.

    B <= 128: a single block equal to the full batch (block dims equal to the
    full array dims are always layout-legal).  Otherwise: the largest
    multiple-of-128 tile that still yields >= 2 grid steps (so both v7x
    TensorCores are used on the 'parallel' batch axis), capped at 2048.
    The network is ~6 MFLOP / ~64 KB of x per 512 rows, so wall time is
    dominated by per-grid-step overhead and the x HBM stream -> bigger tiles
    win; even bt=2048 is only a few MiB of VMEM on every generation.
    """
    if B <= 128:
        return B
    return min(2048, _round_up(pl.cdiv(B, 2), 128))


def _critic_mlp_kernel(x_ref,
                       w1_ref, b1_ref,
                       w2_ref, b2_ref,
                       w3_ref, b3_ref,
                       out_ref, *, use_bf16):
    """Fused forward pass for one batch tile, batch on the lane axis.

      h1 = relu(W1 @ x^T + b1)          (h1, bt)
      h2 = relu(W2 @ h1  + b2)          (h2, bt)
      v  = sum(h2 * w3, axis=0) + b3    (1,  bt)   -- lane-dense value row
    """
    x = x_ref[...]            # (bt, obs)   batch on sublanes (as stored)
    if use_bf16:
        # Only the O(B) x stream is cast in-kernel; weights arrive pre-cast.
        x = x.astype(jnp.bfloat16)

    # Layer 1: contract obs dims of (h1, obs) and (bt, obs) -> (h1, bt).
    # Batch moves onto the lane axis here; no wrapper-side transpose of x.
    h = lax.dot_general(w1_ref[...], x, (((1,), (1,)), ((), ())),
                        preferred_element_type=jnp.float32)
    h = jnp.maximum(h + b1_ref[...], 0.0)            # bias+ReLU in f32 (VPU)

    if use_bf16:
        h = h.astype(jnp.bfloat16)

    # Layer 2: (h2, h1) @ (h1, bt) -> (h2, bt).
    h = jnp.dot(w2_ref[...], h, preferred_element_type=jnp.float32)
    h = jnp.maximum(h + b2_ref[...], 0.0)

    # Value head: VPU multiply + XLU sublane reduction instead of an N=1
    # MXU matmul.  w3 is an (h2, 1) f32 column broadcast over batch lanes.
    v = jnp.sum(h * w3_ref[...], axis=0, keepdims=True) + b3_ref[...]  # (1, bt)
    out_ref[...] = v.astype(out_ref.dtype)


def critic_forward(x, params, *, batch_tile=None, use_bf16=True):
    """Runs the fused critic MLP Pallas kernel.

    x:      (B, obs_dim) float32 (or bfloat16 — used as-is when use_bf16)
    params: dict with w1 (h1,obs), b1 (h1,1), w2 (h2,h1), b2 (h2,1),
            w3 (h2,1), b3 (1,1)   (PyTorch (out,in) weights; column biases)
    returns (B, 1) float32

    use_bf16 (default True): bf16 MXU operands with f32 accumulation; bias,
    ReLU and the value head stay f32.  Opt-out with use_bf16=False for exact
    f32 matmuls.
    """
    B, obs_dim = x.shape
    w1, b1 = params["w1"], params["b1"]
    w2, b2 = params["w2"], params["b2"]
    w3, b3 = params["w3"], params["b3"]
    h1 = w1.shape[0]
    h2 = w2.shape[0]

    if use_bf16:
        # One-time cast of a few KB of grid-resident weights (free in the
        # wrapper; avoids per-grid-step VPU converts and halves weight VMEM).
        w1 = w1.astype(jnp.bfloat16)
        w2 = w2.astype(jnp.bfloat16)

    if batch_tile is None:
        batch_tile = _pick_batch_tile(B)

    # No jnp.pad of x (that was an extra full HBM pass).  Only the tiny
    # output row is rounded up so every (1, batch_tile) output block is full
    # and lane-dense; the ragged last x block's junk lanes stay per-lane and
    # are sliced off below.  Do NOT add cross-lane reductions over batch.
    num_tiles = pl.cdiv(B, batch_tile)
    out_width = num_tiles * batch_tile

    full = lambda i: (0, 0)   # weights / biases resident for every tile

    w_bytes = sum(int(a.size) * a.dtype.itemsize
                  for a in (w1, b1, w2, b2, w3, b3))
    cost = pl.CostEstimate(
        flops=int(2 * B * (obs_dim * h1 + h1 * h2 + h2)),
        transcendentals=0,
        bytes_accessed=int(B * obs_dim * x.dtype.itemsize
                           + w_bytes + out_width * 4),
    )

    out_row = pl.pallas_call(
        functools.partial(_critic_mlp_kernel, use_bf16=use_bf16),
        # Lane-dense output: one row of values, (1, batch_tile) blocks.
        out_shape=jax.ShapeDtypeStruct((1, out_width), jnp.float32),
        grid=(num_tiles,),
        in_specs=[
            pl.BlockSpec((batch_tile, obs_dim), lambda i: (i, 0)),  # x tile
            pl.BlockSpec((h1, obs_dim), full),                      # W1 (out,in)
            pl.BlockSpec((h1, 1), full),                            # b1 column
            pl.BlockSpec((h2, h1), full),                           # W2 (out,in)
            pl.BlockSpec((h2, 1), full),                            # b2 column
            pl.BlockSpec((h2, 1), full),                            # w3 column
            pl.BlockSpec((1, 1), full),                             # b3
        ],
        out_specs=pl.BlockSpec((1, batch_tile), lambda i: (0, i)),
        compiler_params=pltpu.CompilerParams(
            dimension_semantics=("parallel",)),
        cost_estimate=cost,
    )(x, w1, b1, w2, b2, w3, b3)

    return out_row[0, :B].reshape(B, 1)


def init_critic_params(key, obs_dim, hidden_layers):
    """Matches the PyTorch module: orthogonal_ weights, zero biases.

    Weights are kept in PyTorch's (out, in) layout; biases are (out, 1)
    columns; the value-head weight is stored as an (h_last, 1) column.
    """
    layer_sizes = [obs_dim] + list(hidden_layers) + [1]
    ortho = jax.nn.initializers.orthogonal()
    params = {}
    keys = jax.random.split(key, len(layer_sizes) - 1)
    for idx, (fan_in, fan_out) in enumerate(zip(layer_sizes[:-1], layer_sizes[1:])):
        w_pt = ortho(keys[idx], (fan_out, fan_in), jnp.float32)   # (out, in)
        params[f"w{idx + 1}"] = jnp.asarray(w_pt)
        params[f"b{idx + 1}"] = jnp.zeros((fan_out, 1), jnp.float32)
    n = len(layer_sizes) - 1
    params[f"w{n}"] = params[f"w{n}"].T     # value head as (h_last, 1) column
    return params


def critic_reference(x, params):
    """Plain-JAX reference of the same forward pass (for sanity check)."""
    h = jnp.maximum(x @ params["w1"].T + params["b1"].T, 0.0)
    h = jnp.maximum(h @ params["w2"].T + params["b2"].T, 0.0)
    return h @ params["w3"] + params["b3"].T


if __name__ == "__main__":
    key = jax.random.PRNGKey(0)
    k_x, k_p = jax.random.split(key)

    # Small shapes consistent with the module: obs_dim=32, hidden_layers=[64, 64]
    batch, obs_dim = 16, 32
    hidden_layers = [64, 64]

    x = jax.random.normal(k_x, (batch, obs_dim), jnp.float32)
    params = init_critic_params(k_p, obs_dim, hidden_layers)
    ref = critic_reference(x, params)

    # Exact f32 path (single full-array block).
    out_f32 = jax.block_until_ready(critic_forward(x, params, use_bf16=False))
    assert out_f32.shape == (batch, 1)
    assert jnp.allclose(out_f32, ref, atol=1e-4, rtol=1e-4), "f32 mismatch vs reference"

    # Default path: bf16 MXU operands, f32 accumulate / bias / ReLU / head.
    out_bf16 = jax.block_until_ready(critic_forward(x, params))
    assert jnp.allclose(out_bf16, ref, atol=2e-1, rtol=2e-2), "bf16 path out of tolerance"

    # Ragged, multi-tile batch: no wrapper-side padding of x, 2 tiles of 128
    # (second block partial — junk lanes are sliced off by [:B]).
    x_big = jax.random.normal(k_x, (200, obs_dim), jnp.float32)
    out_big = jax.block_until_ready(critic_forward(x_big, params, use_bf16=False))
    assert out_big.shape == (200, 1)
    assert jnp.allclose(out_big, critic_reference(x_big, params),
                        atol=1e-4, rtol=1e-4), "ragged multi-tile mismatch vs reference"

    # Small batch that is not a multiple of 8: single full-array block.
    x_odd = jax.random.normal(k_x, (10, obs_dim), jnp.float32)
    out_odd = jax.block_until_ready(critic_forward(x_odd, params, use_bf16=False))
    assert out_odd.shape == (10, 1)
    assert jnp.allclose(out_odd, critic_reference(x_odd, params),
                        atol=1e-4, rtol=1e-4), "small-batch mismatch vs reference"

    print("KERNEL_OK")
</pallas_src>

<mosaic_0001>
module attributes {stable_mosaic.version = 11 : i64} {
  func.func @_critic_mlp_kernel(%arg0: i32, %arg1: memref<16x32xf32, #tpu.memory_space<vmem>>, %arg2: memref<64x32xf32, #tpu.memory_space<vmem>>, %arg3: memref<64x1xf32, #tpu.memory_space<vmem>>, %arg4: memref<64x64xf32, #tpu.memory_space<vmem>>, %arg5: memref<64x1xf32, #tpu.memory_space<vmem>>, %arg6: memref<64x1xf32, #tpu.memory_space<vmem>>, %arg7: memref<1x1xf32, #tpu.memory_space<vmem>>, %arg8: memref<1x16xf32, #tpu.memory_space<vmem>>) attributes {dimension_semantics = [#tpu.dimension_semantics<parallel>], iteration_bounds = array<i64: 1>, scalar_prefetch = 0 : i64, scratch_operands = 0 : i64, tpu.core_type = #tpu.core_type<tc>, window_params = [{transform_indices = @transform_0, window_bounds = array<i64: 16, 32>}, {pipeline_mode = #tpu.pipeline_mode<synchronous>, transform_indices = @transform_1, window_bounds = array<i64: 64, 32>}, {pipeline_mode = #tpu.pipeline_mode<synchronous>, transform_indices = @transform_2, window_bounds = array<i64: 64, 1>}, {pipeline_mode = #tpu.pipeline_mode<synchronous>, transform_indices = @transform_3, window_bounds = array<i64: 64, 64>}, {pipeline_mode = #tpu.pipeline_mode<synchronous>, transform_indices = @transform_4, window_bounds = array<i64: 64, 1>}, {pipeline_mode = #tpu.pipeline_mode<synchronous>, transform_indices = @transform_5, window_bounds = array<i64: 64, 1>}, {pipeline_mode = #tpu.pipeline_mode<synchronous>, transform_indices = @transform_6, window_bounds = array<i64: 1, 1>}, {transform_indices = @transform_7, window_bounds = array<i64: 1, 16>}]} {
    %c0 = arith.constant 0 : index
    %c0_0 = arith.constant 0 : index
    %0 = vector.load %arg1[%c0, %c0_0] : memref<16x32xf32, #tpu.memory_space<vmem>>, vector<16x32xf32>
    %c0_1 = arith.constant 0 : index
    %c0_2 = arith.constant 0 : index
    %1 = vector.load %arg2[%c0_1, %c0_2] : memref<64x32xf32, #tpu.memory_space<vmem>>, vector<64x32xf32>
    %cst = arith.constant dense<0.000000e+00> : vector<64x16xf32>
    %2 = tpu.matmul %1, %0, %cst {dimension_numbers = #tpu.dot_dimension_numbers<[1], [1], [0], [0], [0, 0, 1, 0], [], []>} : vector<64x32xf32>, vector<16x32xf32>, vector<64x16xf32> -> vector<64x16xf32>
    %c0_3 = arith.constant 0 : index
    %c0_4 = arith.constant 0 : index
    %3 = vector.load %arg3[%c0_3, %c0_4] : memref<64x1xf32, #tpu.memory_space<vmem>>, vector<64x1xf32>
    %4 = vector.broadcast %3 : vector<64x1xf32> to vector<64x16xf32>
    %5 = arith.addf %2, %4 : vector<64x16xf32>
    %cst_5 = arith.constant 0.000000e+00 : f32
    %6 = vector.broadcast %cst_5 : f32 to vector<64x16xf32>
    %7 = arith.maximumf %5, %6 : vector<64x16xf32>
    %c0_6 = arith.constant 0 : index
    %c0_7 = arith.constant 0 : index
    %8 = vector.load %arg4[%c0_6, %c0_7] : memref<64x64xf32, #tpu.memory_space<vmem>>, vector<64x64xf32>
    %cst_8 = arith.constant dense<0.000000e+00> : vector<64x16xf32>
    %9 = tpu.matmul %8, %7, %cst_8 {dimension_numbers = #tpu.dot_dimension_numbers<[1], [0], [0], [1], [0, 0, 1, 1], [], []>} : vector<64x64xf32>, vector<64x16xf32>, vector<64x16xf32> -> vector<64x16xf32>
    %c0_9 = arith.constant 0 : index
    %c0_10 = arith.constant 0 : index
    %10 = vector.load %arg5[%c0_9, %c0_10] : memref<64x1xf32, #tpu.memory_space<vmem>>, vector<64x1xf32>
    %11 = vector.broadcast %10 : vector<64x1xf32> to vector<64x16xf32>
    %12 = arith.addf %9, %11 : vector<64x16xf32>
    %cst_11 = arith.constant 0.000000e+00 : f32
    %13 = vector.broadcast %cst_11 : f32 to vector<64x16xf32>
    %14 = arith.maximumf %12, %13 : vector<64x16xf32>
    %c0_12 = arith.constant 0 : index
    %c0_13 = arith.constant 0 : index
    %15 = vector.load %arg6[%c0_12, %c0_13] : memref<64x1xf32, #tpu.memory_space<vmem>>, vector<64x1xf32>
    %16 = vector.broadcast %15 : vector<64x1xf32> to vector<64x16xf32>
    %17 = arith.mulf %14, %16 : vector<64x16xf32>
    %cst_14 = arith.constant dense<0.000000e+00> : vector<16xf32>
    %18 = vector.multi_reduction <add>, %17, %cst_14 [0] : vector<64x16xf32> to vector<16xf32>
    %19 = vector.shape_cast %18 : vector<16xf32> to vector<1x16xf32>
    %c0_15 = arith.constant 0 : index
    %c0_16 = arith.constant 0 : index
    %20 = vector.load %arg7[%c0_15, %c0_16] : memref<1x1xf32, #tpu.memory_space<vmem>>, vector<1x1xf32>
    %21 = vector.broadcast %20 : vector<1x1xf32> to vector<1x16xf32>
    %22 = arith.addf %19, %21 : vector<1x16xf32>
    %c0_17 = arith.constant 0 : index
    %c0_18 = arith.constant 0 : index
    %23 = vector.load %arg8[%c0_17, %c0_18] : memref<1x16xf32, #tpu.memory_space<vmem>>, vector<1x16xf32>
    tpu.vector_store %arg8[%c0_17, %c0_18], %22 {strides = array<i32>} : memref<1x16xf32, #tpu.memory_space<vmem>>, vector<1x16xf32>,
    return
  }
  func.func @transform_0(%arg0: i32) -> (i32, i32) {
    %c0_i32 = arith.constant 0 : i32
    %c0_i32_0 = arith.constant 0 : i32
    return %arg0, %c0_i32 : i32, i32
  }
  func.func @transform_1(%arg0: i32) -> (i32, i32) {
    %c0_i32 = arith.constant 0 : i32
    %c0_i32_0 = arith.constant 0 : i32
    %c0_i32_1 = arith.constant 0 : i32
    return %c0_i32, %c0_i32_0 : i32, i32
  }
  func.func @transform_2(%arg0: i32) -> (i32, i32) {
    %c0_i32 = arith.constant 0 : i32
    %c0_i32_0 = arith.constant 0 : i32
    %c0_i32_1 = arith.constant 0 : i32
    return %c0_i32, %c0_i32_0 : i32, i32
  }
  func.func @transform_3(%arg0: i32) -> (i32, i32) {
    %c0_i32 = arith.constant 0 : i32
    %c0_i32_0 = arith.constant 0 : i32
    %c0_i32_1 = arith.constant 0 : i32
    return %c0_i32, %c0_i32_0 : i32, i32
  }
  func.func @transform_4(%arg0: i32) -> (i32, i32) {
    %c0_i32 = arith.constant 0 : i32
    %c0_i32_0 = arith.constant 0 : i32
    %c0_i32_1 = arith.constant 0 : i32
    return %c0_i32, %c0_i32_0 : i32, i32
  }
  func.func @transform_5(%arg0: i32) -> (i32, i32) {
    %c0_i32 = arith.constant 0 : i32
    %c0_i32_0 = arith.constant 0 : i32
    %c0_i32_1 = arith.constant 0 : i32
    return %c0_i32, %c0_i32_0 : i32, i32
  }
  func.func @transform_6(%arg0: i32) -> (i32, i32) {
    %c0_i32 = arith.constant 0 : i32
    %c0_i32_0 = arith.constant 0 : i32
    %c0_i32_1 = arith.constant 0 : i32
    return %c0_i32, %c0_i32_0 : i32, i32
  }
  func.func @transform_7(%arg0: i32) -> (i32, i32) {
    %c0_i32 = arith.constant 0 : i32
    %c0_i32_0 = arith.constant 0 : i32
    return %c0_i32, %arg0 : i32, i32
  }
}

</mosaic_0001>

<bundles_post_ra>
// kernel: tpu_custom_call.1
= control target key start
LH: loop header
LB: loop body
LE: loop exit
PB: predicated region body
PF: predicated region fallthrough
CT: control target
= control target key end

     0   :  { %s662_s0 = inlined_call_operand.vmem [shape: f32[16,32], index: 0, kind: input, shape index: {}]   ;;  %s663_s1 = inlined_call_operand.vmem [shape: f32[64,32], index: 1, kind: input, shape index: {}]   ;;  %s664_s2 = inlined_call_operand.vmem [shape: f32[64,1], index: 2, kind: input, shape index: {}]   ;;  %s665_s3 = inlined_call_operand.vmem [shape: f32[64,64], index: 3, kind: input, shape index: {}]   ;;  %s666_s4 = inlined_call_operand.vmem [shape: f32[64,1], index: 4, kind: input, shape index: {}]   ;;  %s667_s5 = inlined_call_operand.vmem [shape: f32[64,1], index: 5, kind: input, shape index: {}]   ;;  %s668_s6 = inlined_call_operand.<no memory space> [shape: f32[1,1], index: 6, kind: input, shape index: {}]   ;;  %s669_s7 = inlined_call_operand.hbm [shape: f32[1,16], index: 7, kind: output, shape index: {}]  }
   0x1   :  { %v12_v0 = vstv %s668_s6 }
   0x2   :  { %13 = vst [vmem:[#allocation2] sm:$0x1] %v12_v0 }
   0x3   :  { %v30_v1 = vld [vmem:[%s662_s0 + $0x8] sm:$0xff]  ;;  %vm87_vm0 = vcmask 261120   ;;  %v46_v2 = vld [vmem:[%s664_s2 + $0x38] sm:$0xff]  ;;  %v460_v4 = vmov 0   ;;  %v29_v6 = vld [vmem:[%s662_s0] sm:$0xff] }
   0x4   :  { %v44_v3 = vld [vmem:[%s664_s2 + $0x28] sm:$0xff]  ;;  %432 = vset.pattern.permute.xlu1 %v460_v4  ;;  %431 = vset.pattern.permute.xlu0 %v460_v4  ;;  %v42_v5 = vld [vmem:[%s664_s2 + $0x18] sm:$0xff]  ;;  %v31_v7 = vld [vmem:[%s663_s1] sm:$0xff] }
   0x5   :  { %401 = vmatpush.xpose.msk.msra.mxu0 %vm87_vm0, %v30_v1  ;;  %419 = vmatpush.xpose.msk.msra.mxu3 %vm87_vm0, %v30_v1  ;;  %v36_v8 = vld [vmem:[%s663_s1 + $0x28] sm:$0xff]  ;;  %v45_v9 = vld [vmem:[%s664_s2 + $0x30] sm:$0xff]  ;;  %v43_v10 = vld [vmem:[%s664_s2 + $0x20] sm:$0xff] }
   0x6   :  { %84 = vperm.xlu0 %431, %v46_v2   ;;  %74 = vperm.xlu1 %432, %v44_v3  }
   0x7   :  { %433 = vset.pattern.permute.xlu2 %v460_v4 }
   0x8   :  { %64 = vperm.xlu2 %433, %v42_v5  }
   0x9   :  { %402 = vmatpush.xpose.msk.msra.mxu0 %vm87_vm0, %v29_v6  ;;  %420 = vmatpush.xpose.msk.msra.mxu3 %vm87_vm0, %v29_v6 }
   0xa   :  { %14 = vsyncpa [#allocation4], 0  ;;  %v41_v11 = vld [vmem:[%s664_s2 + $0x10] sm:$0xff]  ;;  %v32_v12 = vld [vmem:[%s663_s1 + $0x8] sm:$0xff]  ;;  %vm223_vm1 = vcmask 523264   ;;  %vm353_vm2 = vcmask 130048  }
   0xb   :  { %v37_v13 = vld [vmem:[%s663_s1 + $0x30] sm:$0xff]  ;;  %v40_v14 = vld [vmem:[%s664_s2 + $0x8] sm:$0xff]  ;;  %v39_v15 = vld [vmem:[%s664_s2] sm:$0xff]  ;;  %vm383_vm3 = vcmask 122880  }
   0xc   :  { %403 = vmatmul.msk.f32.vlgmr.msra.gmra.mxu0 %vm87_vm0, %v31_v7  ;;  %408 = vmatmul.msk.f32.vlgmr.msra.gmra.mxu3 %vm87_vm0, %v36_v8  ;;  %v175_v16 = vld [vmem:[%s666_s4] sm:$0xff]  ;;  %v33_v17 = vld [vmem:[%s663_s1 + $0x10] sm:$0xff]  ;;  %v38_v18 = vld [vmem:[%s663_s1 + $0x38] sm:$0xff] }
   0xd   :  { %v176_v19 = vld [vmem:[%s666_s4 + $0x8] sm:$0xff]  ;;  %v177_v20 = vld [vmem:[%s666_s4 + $0x10] sm:$0xff]  ;;  %v178_v21 = vld [vmem:[%s666_s4 + $0x18] sm:$0xff] }
   0xe   :  { %79 = vperm.xlu0 %431, %v45_v9   ;;  %69 = vperm.xlu1 %432, %v43_v10   ;;  %v34_v22 = vld [vmem:[%s663_s1 + $0x18] sm:$0xff]  ;;  %v179_v23 = vld [vmem:[%s666_s4 + $0x20] sm:$0xff]  ;;  %v180_v24 = vld [vmem:[%s666_s4 + $0x28] sm:$0xff] }
   0xf   :  { %v297_v25 = vld [vmem:[%s667_s5] sm:$0xff]  ;;  %v298_v27 = vld [vmem:[%s667_s5 + $0x8] sm:$0xff]  ;;  %v299_v28 = vld [vmem:[%s667_s5 + $0x10] sm:$0xff] }
  0x10   :  { %59 = vperm.xlu2 %433, %v41_v11   ;;  %v35_v26 = vld [vmem:[%s663_s1 + $0x20] sm:$0xff]  ;;  %v300_v29 = vld [vmem:[%s667_s5 + $0x18] sm:$0xff]  ;;  %v181_v30 = vld [vmem:[%s666_s4 + $0x30] sm:$0xff]  ;;  %s392_s1 = sshll.u32 %s669_s7, 4  ;;  %s393_s1 = int_to_ptr.hbm [resolvable:$true] %s392_s1 }
  0x11   :  { %v301_v31 = vld [vmem:[%s667_s5 + $0x20] sm:$0xff]  ;;  %v182_v32 = vld [vmem:[%s666_s4 + $0x38] sm:$0xff]  ;;  %v302_v33 = vld [vmem:[%s667_s5 + $0x28] sm:$0xff] }
  0x12   :  { %v303_v34 = vld [vmem:[%s667_s5 + $0x30] sm:$0xff]  ;;  %v304_v35 = vld [vmem:[%s667_s5 + $0x38] sm:$0xff]  ;;  %v375_v36 = vld [vmem:[#allocation2] sm:$0x1] }
  0x13   :  { %v167_v5 = vld [vmem:[%s665_s3] sm:$0xff]  ;;  %v168_v7 = vld [vmem:[%s665_s3 + $0x8] sm:$0xff]  ;;  %v169_v9 = vld [vmem:[%s665_s3 + $0x10] sm:$0xff] }
  0x14   :  { %404 = vmatmul.msk.f32.gmra.mxu0 %vm87_vm0, %v32_v12  ;;  %409 = vmatmul.msk.f32.gmra.mxu3 %vm87_vm0, %v37_v13  ;;  %v171_v6 = vld [vmem:[%s665_s3 + $0x20] sm:$0xff]  ;;  %v172_v8 = vld [vmem:[%s665_s3 + $0x28] sm:$0xff]  ;;  %v173_v10 = vld [vmem:[%s665_s3 + $0x30] sm:$0xff] }
  0x15   :  { %v170_v11 = vld [vmem:[%s665_s3 + $0x18] sm:$0xff] }
  0x16   :  { %54 = vperm.xlu0 %431, %v40_v14   ;;  %49 = vperm.xlu1 %432, %v39_v15   ;;  %v174_v12 = vld [vmem:[%s665_s3 + $0x38] sm:$0xff]  ;;  %s461_s3 = smov [#allocation3]  }
  0x17   :  { %s390_s30 = sshll.u32 %s461_s3, 4  ;;  %s391_s30 = int_to_ptr.vmem [resolvable:$true] %s390_s30 }
  0x18   :  { %185 = vperm.xlu2 %433, %v175_v16  }
  0x1c   :  { %405 = vmatmul.msk.f32.gmra.mxu0 %vm87_vm0, %v33_v17  ;;  %410 = vmatmul.msk.f32.gmra.mxu3 %vm87_vm0, %v38_v18 }
  0x1e   :  { %190 = vperm.xlu0 %431, %v176_v19   ;;  %195 = vperm.xlu1 %432, %v177_v20  }
  0x20   :  { %200 = vperm.xlu2 %433, %v178_v21  }
  0x24   :  { %406 = vmatmul.msk.f32.gmra.mxu0 %vm87_vm0, %v34_v22 }
  0x26   :  { %205 = vperm.xlu0 %431, %v179_v23   ;;  %210 = vperm.xlu1 %432, %v180_v24  }
  0x28   :  { %307 = vperm.xlu2 %433, %v297_v25  }
  0x2c   :  { %407 = vmatmul.msk.f32.gmra.mxu0 %vm87_vm0, %v35_v26 }
  0x2e   :  { %312 = vperm.xlu0 %431, %v298_v27   ;;  %317 = vperm.xlu1 %432, %v299_v28  }
  0x30   :  { %322 = vperm.xlu2 %433, %v300_v29  }
  0x36   :  { %215 = vperm.xlu0 %431, %v181_v30   ;;  %327 = vperm.xlu1 %432, %v301_v31  }
  0x38   :  { %220 = vperm.xlu2 %433, %v182_v32  }
  0x3e   :  { %332 = vperm.xlu0 %431, %v302_v33   ;;  %337 = vperm.xlu1 %432, %v303_v34  }
  0x40   :  { %342 = vperm.xlu2 %433, %v304_v35  }
  0x46   :  { %378 = vperm.xlu0 %431, %v375_v36  }
  0x62   :  { %v65_v48 = vpop.permute.xlu2 %64 }
  0x6a   :  { %v60_v58 = vpop.permute.xlu2 %59 }
  0x72   :  { %v186_v13 = vpop.permute.xlu2 %185 }
  0x78   :  { %v85_v40 = vpop.permute.xlu0 %84  ;;  %v75_v42 = vpop.permute.xlu1 %74 }
  0x7a   :  { %v201_v16 = vpop.permute.xlu2 %200 }
  0x80   :  { %v80_v44 = vpop.permute.xlu0 %79  ;;  %v70_v52 = vpop.permute.xlu1 %69 }
  0x82   :  { %v308_v20 = vpop.permute.xlu2 %307 }
  0x88   :  { %v55_v61 = vpop.permute.xlu0 %54  ;;  %v50_v62 = vpop.permute.xlu1 %49 }
  0x89   :  { %v135_v37 = vpop.f32.mrf.mxu0 }
  0x8a   :  { %v136_v1 = vadd.f32 %v135_v37, %v50_v62  ;;  %v323_v26 = vpop.permute.xlu2 %322 }
  0x8c   :  { %v159_v4 = vmax.f32 %v136_v1, 0.0 }
  0x8f   :  { %v150_v38 = vpop.f32.mrf.mxu3 }
  0x90   :  { %v151_v50 = vadd.f32 %v150_v38, %v75_v42  ;;  %v191_v14 = vpop.permute.xlu0 %190  ;;  %v196_v15 = vpop.permute.xlu1 %195 }
  0x91   :  { %v138_v39 = vpop.f32.mrf.mxu0 }
  0x92   :  { %v164_v54 = vmax.f32 %v151_v50, 0.0  ;;  %v139_v63 = vadd.f32 %v138_v39, %v55_v61  ;;  %v221_v42 = vpop.permute.xlu2 %220 }
  0x94   :  { %v160_v3 = vmax.f32 %v139_v63, 0.0 }
  0x97   :  { %v153_v41 = vpop.f32.mrf.mxu3 }
  0x98   :  { %v154_v46 = vadd.f32 %v153_v41, %v80_v44  ;;  %v206_v17 = vpop.permute.xlu0 %205  ;;  %v211_v19 = vpop.permute.xlu1 %210 }
  0x99   :  { %v141_v43 = vpop.f32.mrf.mxu0 }
  0x9a   :  { %v165_v53 = vmax.f32 %v154_v46, 0.0  ;;  %v142_v59 = vadd.f32 %v141_v43, %v60_v58 }
  0x9c   :  { %v161_v2 = vmax.f32 %v142_v59, 0.0 }
  0x9f   :  { %v156_v45 = vpop.f32.mrf.mxu3 }
  0xa0   :  { %v157_v47 = vadd.f32 %v156_v45, %v85_v40  ;;  %v313_v23 = vpop.permute.xlu0 %312  ;;  %v318_v24 = vpop.permute.xlu1 %317 }
  0xa1   :  { %v144_v49 = vpop.f32.mrf.mxu0 }
  0xa2   :  { %v166_v51 = vmax.f32 %v157_v47, 0.0  ;;  %v145_v56 = vadd.f32 %v144_v49, %v65_v48 }
  0xa4   :  { %256 = vmatpush.msra.mxu1 %v166_v51  ;;  %421 = vmatpush.msra.mxu2 %v166_v51  ;;  %v162_v0 = vmax.f32 %v145_v56, 0.0 }
  0xa6   :  { %257 = vmatpush.msra.mxu1 %v165_v53  ;;  %422 = vmatpush.msra.mxu2 %v165_v53 }
  0xa8   :  { %258 = vmatpush.msra.mxu1 %v164_v54  ;;  %423 = vmatpush.msra.mxu2 %v164_v54  ;;  %v216_v34 = vpop.permute.xlu0 %215  ;;  %v328_v37 = vpop.permute.xlu1 %327 }
  0xa9   :  { %v147_v55 = vpop.f32.mrf.mxu0 }
  0xaa   :  { %v148_v57 = vadd.f32 %v147_v55, %v70_v52 }
  0xac   :  { %v163_v60 = vmax.f32 %v148_v57, 0.0 }
  0xae   :  { %259 = vmatpush.msra.mxu1 %v163_v60  ;;  %424 = vmatpush.msra.mxu2 %v163_v60 }
  0xb0   :  { %260 = vmatpush.msra.mxu1 %v162_v0  ;;  %425 = vmatpush.msra.mxu2 %v162_v0  ;;  %v333_v56 = vpop.permute.xlu0 %332  ;;  %v338_v62 = vpop.permute.xlu1 %337 }
  0xb2   :  { %261 = vmatpush.msra.mxu1 %v161_v2  ;;  %426 = vmatpush.msra.mxu2 %v161_v2 }
  0xb4   :  { %262 = vmatpush.msra.mxu1 %v160_v3  ;;  %427 = vmatpush.msra.mxu2 %v160_v3  ;;  %v343_v3 = vpop.permute.xlu2 %342 }
  0xb6   :  { %263 = vmatpush.msra.mxu1 %v159_v4  ;;  %428 = vmatpush.msra.mxu2 %v159_v4 }
  0xb7   :  { %411 = vmatmul.msk.f32.vlgmr.msra.gmra.mxu1 %vm223_vm1, %v167_v5  ;;  %415 = vmatmul.msk.f32.vlgmr.msra.gmra.mxu2 %vm223_vm1, %v171_v6 }
  0xbf   :  { %412 = vmatmul.msk.f32.gmra.mxu1 %vm223_vm1, %v168_v7  ;;  %416 = vmatmul.msk.f32.gmra.mxu2 %vm223_vm1, %v172_v8 }
  0xc7   :  { %413 = vmatmul.msk.f32.gmra.mxu1 %vm223_vm1, %v169_v9  ;;  %417 = vmatmul.msk.f32.gmra.mxu2 %vm223_vm1, %v173_v10 }
  0xcf   :  { %414 = vmatmul.msk.f32.gmra.mxu1 %vm223_vm1, %v170_v11  ;;  %418 = vmatmul.msk.f32.gmra.mxu2 %vm223_vm1, %v174_v12 }
 0x134   :  { %v265_v18 = vpop.f32.mrf.mxu1 }
 0x135   :  { %v266_v28 = vadd.f32 %v265_v18, %v186_v13 }
 0x137   :  { %v289_v32 = vmax.f32 %v266_v28, 0.0 }
 0x139   :  { %v345_v39 = vmul.f32 %v308_v20, %v289_v32 }
 0x13a   :  { %v277_v21 = vpop.f32.mrf.mxu2 }
 0x13b   :  { %v278_v35 = vadd.f32 %v277_v21, %v206_v17  ;;  %v354_v48 = vsel %vm353_vm2, %v345_v39, 0.0 }
 0x13c   :  { %v268_v22 = vpop.f32.mrf.mxu1 }
 0x13d   :  { %v269_v25 = vadd.f32 %v268_v22, %v191_v14  ;;  %v293_v44 = vmax.f32 %v278_v35, 0.0 }
 0x13f   :  { %v290_v30 = vmax.f32 %v269_v25, 0.0  ;;  %v349_v53 = vmul.f32 %v328_v37, %v293_v44 }
 0x141   :  { %v346_v36 = vmul.f32 %v313_v23, %v290_v30  ;;  %v361_v0 = vsel %vm353_vm2, %v349_v53, 0.0 }
 0x142   :  { %v280_v27 = vpop.f32.mrf.mxu2 }
 0x143   :  { %v281_v40 = vadd.f32 %v280_v27, %v211_v19  ;;  %v355_v45 = vsel %vm353_vm2, %v346_v36, 0.0 }
 0x144   :  { %v271_v29 = vpop.f32.mrf.mxu1  ;;  %v356_v52 = vadd.f32 %v355_v45, %v354_v48 }
 0x145   :  { %v272_v31 = vadd.f32 %v271_v29, %v196_v15  ;;  %v294_v49 = vmax.f32 %v281_v40, 0.0 }
 0x147   :  { %v291_v33 = vmax.f32 %v272_v31, 0.0  ;;  %v350_v59 = vmul.f32 %v333_v56, %v294_v49 }
 0x149   :  { %v347_v41 = vmul.f32 %v318_v24, %v291_v33  ;;  %v363_v5 = vsel %vm353_vm2, %v350_v59, 0.0 }
 0x14a   :  { %v283_v38 = vpop.f32.mrf.mxu2 }
 0x14b   :  { %v284_v46 = vadd.f32 %v283_v38, %v216_v34  ;;  %v357_v50 = vsel %vm353_vm2, %v347_v41, 0.0 }
 0x14c   :  { %v274_v43 = vpop.f32.mrf.mxu1  ;;  %v358_v57 = vadd.f32 %v357_v50, %v356_v52 }
 0x14d   :  { %v275_v47 = vadd.f32 %v274_v43, %v201_v16  ;;  %v295_v54 = vmax.f32 %v284_v46, 0.0  ;;  %v379_v16 = vpop.permute.xlu0 %378 }
 0x14e   :  { %v381_v18 = vperm.slane %v379_v16, 0 }
 0x14f   :  { %v292_v51 = vmax.f32 %v275_v47, 0.0  ;;  %v351_v1 = vmul.f32 %v338_v62, %v295_v54 }
 0x151   :  { %v348_v55 = vmul.f32 %v323_v26, %v292_v51  ;;  %v365_v8 = vsel %vm353_vm2, %v351_v1, 0.0 }
 0x152   :  { %v286_v58 = vpop.f32.mrf.mxu2 }
 0x153   :  { %v359_v60 = vsel %vm353_vm2, %v348_v55, 0.0  ;;  %v287_v61 = vadd.f32 %v286_v58, %v221_v42 }
 0x154   :  { %v360_v63 = vadd.f32 %v359_v60, %v358_v57 }
 0x155   :  { %v296_v2 = vmax.f32 %v287_v61, 0.0 }
 0x156   :  { %v362_v4 = vadd.f32 %v361_v0, %v360_v63 }
 0x157   :  { %v352_v6 = vmul.f32 %v343_v3, %v296_v2 }
 0x158   :  { %v364_v7 = vadd.f32 %v363_v5, %v362_v4 }
 0x159   :  { %v367_v10 = vsel %vm353_vm2, %v352_v6, 0.0 }
 0x15a   :  { %v366_v9 = vadd.f32 %v365_v8, %v364_v7 }
 0x15c   :  { %v368_v11 = vadd.f32 %v367_v10, %v366_v9 }
 0x15e   :  { %v369_v12 = vrot.slane %v368_v11, 4 }
 0x160   :  { %v370_v13 = vadd.f32 %v369_v12, %v368_v11 }
 0x162   :  { %v371_v14 = vrot.slane %v370_v13, 2 }
 0x164   :  { %v372_v15 = vadd.f32 %v371_v14, %v370_v13 }
 0x166   :  { %v373_v17 = vrot.slane %v372_v15, 1 }
 0x168   :  { %v374_v19 = vadd.f32 %v373_v17, %v372_v15 }
 0x16a   :  { %v382_v20 = vadd.f32 %v381_v18, %v374_v19 }
 0x16c   :  { %384 = vst.msk [vmem:[#allocation3] sm:$0x1] %vm383_vm3, %v382_v20 }
 0x16d   :  { %395 = dma.vmem_to_hbm [thread:$0]  %s391_s30, 16, %s393_s1, [#allocation4]  }
 0x16e   :  { %458 = dma.done.wait [#allocation4], 16  }
 0x16f   :  { %459 = vsyncadd [#allocation4], 4294967280 }
 0x170   :  { %400 = vsyncpa [#allocation4], 1 }

</bundles_post_ra>
